<compile_context>
chip_gen: v7x
topology: tpu7x:2x2x1
jax: 0.10.0
libtpu: 0.0.40
codegen_flags: <defaults>
</compile_context>

<pallas_src>
import functools

import jax
import jax.numpy as jnp
from jax.experimental import pallas as pl
from jax.experimental.pallas import tpu as pltpu


# ------------------------------ small helpers --------------------------------

def _round_up(x, m):
    return (x + m - 1) // m * m


def _pick_block_rows(n_rows, bytes_per_row, *, budget=24 * 1024 * 1024, cap=1024):
    """Largest multiple-of-8 row tile that fits a VMEM budget (and the input)."""
    by_budget = max(1, budget // max(int(bytes_per_row), 1))
    rows = min(cap, by_budget, _round_up(n_rows, 8))
    return max(8, (rows // 8) * 8)


def _keep_mask(shape, seed_scalar, row_offset, p):
    """Per-element Bernoulli(1-p) keep mask via a counter-based 32-bit hash.

    Works both compiled (Mosaic) and in interpret mode (no pltpu.prng_* use).
    The hash input is the global element index, so the mask is independent of
    the tiling; the seed is mixed in with a large odd constant (decorrelates
    neighbouring tiles / seeds).
    """
    rows = jax.lax.broadcasted_iota(jnp.int32, shape, 0)
    cols = jax.lax.broadcasted_iota(jnp.int32, shape, 1)
    gidx = ((rows + row_offset).astype(jnp.uint32) * jnp.uint32(shape[1])
            + cols.astype(jnp.uint32))
    z = gidx + seed_scalar.astype(jnp.uint32) * jnp.uint32(0x9E3779B9)
    # lowbias32-style finalizer
    z = z ^ (z >> 16)
    z = z * jnp.uint32(0x21F0AAAD)
    z = z ^ (z >> 15)
    z = z * jnp.uint32(0x735A2D97)
    z = z ^ (z >> 15)
    thresh = jnp.uint32(min(int(round(float(p) * 4294967296.0)), 4294967295))
    return z >= thresh


# ----------------- fused LN -> Linear -> dropout -> residual ------------------

def _fused_kernel(seed_ref, x_ref, w_ref, b_ref, g_ref, beta_ref, o_ref,
                  *, eps, p):
    x = x_ref[...].astype(jnp.float32)
    # LayerNorm (biased variance, torch semantics).
    mean = jnp.mean(x, axis=-1, keepdims=True)
    xc = x - mean
    var = jnp.mean(xc * xc, axis=-1, keepdims=True)
    normed = (xc * jax.lax.rsqrt(var + eps)) * g_ref[...] + beta_ref[...]
    # Linear sublayer on the MXU with f32 accumulation.
    y = jnp.dot(normed.astype(w_ref.dtype), w_ref[...],
                preferred_element_type=jnp.float32)
    y = y + b_ref[...].astype(jnp.float32)
    # Inverted dropout.
    if p >= 1.0:
        y = jnp.zeros_like(y)
    elif p > 0.0:
        row0 = pl.program_id(0) * y.shape[0]
        keep = _keep_mask(y.shape, seed_ref[0], row0, p)
        y = jnp.where(keep, y * (1.0 / (1.0 - p)), 0.0)
    # Residual.
    o_ref[...] = (x + y).astype(o_ref.dtype)


def fused_ln_linear_dropout_residual(x2d, W, b, gamma, beta, *, p, seed,
                                     eps=1e-5):
    R, H = x2d.shape
    assert W.shape == (H, H) and b.shape == (H,)
    w_bytes = H * H * 4
    # x tile + out tile, each double-buffered, in f32.
    bytes_per_row = 4 * H * 4
    budget = max(8 * bytes_per_row, 24 * 1024 * 1024 - w_bytes)
    tm = _pick_block_rows(R, bytes_per_row, budget=budget, cap=512)
    Rp = _round_up(R, tm)
    if Rp != R:
        x2d = jnp.pad(x2d, ((0, Rp - R), (0, 0)))
    seed_arr = jnp.asarray([seed], dtype=jnp.int32)

    out = pl.pallas_call(
        functools.partial(_fused_kernel, eps=float(eps), p=float(p)),
        out_shape=jax.ShapeDtypeStruct((Rp, H), x2d.dtype),
        grid_spec=pltpu.PrefetchScalarGridSpec(
            num_scalar_prefetch=1,
            grid=(Rp // tm,),
            in_specs=[
                pl.BlockSpec((tm, H), lambda i, s: (i, 0)),   # x
                pl.BlockSpec((H, H), lambda i, s: (0, 0)),    # W (resident)
                pl.BlockSpec((1, H), lambda i, s: (0, 0)),    # bias
                pl.BlockSpec((1, H), lambda i, s: (0, 0)),    # gamma
                pl.BlockSpec((1, H), lambda i, s: (0, 0)),    # beta
            ],
            out_specs=pl.BlockSpec((tm, H), lambda i, s: (i, 0)),
        ),
        compiler_params=pltpu.CompilerParams(
            dimension_semantics=("parallel",),
            vmem_limit_bytes=64 * 1024 * 1024,
        ),
    )(seed_arr, x2d, W, b.reshape(1, H), gamma.reshape(1, H),
      beta.reshape(1, H))
    return out[:R]


# ------------------------- generic path: LayerNorm ----------------------------

def _layernorm_kernel(x_ref, g_ref, b_ref, o_ref, *, eps):
    x = x_ref[...].astype(jnp.float32)
    mean = jnp.mean(x, axis=-1, keepdims=True)
    xc = x - mean
    var = jnp.mean(xc * xc, axis=-1, keepdims=True)
    xn = xc * jax.lax.rsqrt(var + eps)
    o_ref[...] = (xn * g_ref[...] + b_ref[...]).astype(o_ref.dtype)


def layernorm(x2d, gamma, beta, *, eps=1e-5):
    R, H = x2d.shape
    # x tile + out tile, double-buffered, f32.
    block_rows = _pick_block_rows(R, 4 * H * 4, cap=512)
    Rp = _round_up(R, block_rows)
    if Rp != R:
        x2d = jnp.pad(x2d, ((0, Rp - R), (0, 0)))
    out = pl.pallas_call(
        functools.partial(_layernorm_kernel, eps=float(eps)),
        out_shape=jax.ShapeDtypeStruct((Rp, H), x2d.dtype),
        grid_spec=pltpu.PrefetchScalarGridSpec(
            num_scalar_prefetch=0,
            grid=(Rp // block_rows,),
            in_specs=[
                pl.BlockSpec((block_rows, H), lambda i: (i, 0)),
                pl.BlockSpec((1, H), lambda i: (0, 0)),
                pl.BlockSpec((1, H), lambda i: (0, 0)),
            ],
            out_specs=pl.BlockSpec((block_rows, H), lambda i: (i, 0)),
        ),
        compiler_params=pltpu.CompilerParams(
            dimension_semantics=("parallel",),
            vmem_limit_bytes=64 * 1024 * 1024,
        ),
    )(x2d, gamma.reshape(1, H).astype(jnp.float32),
      beta.reshape(1, H).astype(jnp.float32))
    return out[:R]


# ------------------- generic path: residual + dropout -------------------------

def _residual_dropout_kernel(seed_ref, x_ref, y_ref, o_ref, *, p):
    x = x_ref[...].astype(jnp.float32)
    y = y_ref[...].astype(jnp.float32)
    if p >= 1.0:
        y = jnp.zeros_like(y)
    elif p > 0.0:
        row0 = pl.program_id(0) * y.shape[0]
        keep = _keep_mask(y.shape, seed_ref[0], row0, p)
        y = jnp.where(keep, y * (1.0 / (1.0 - p)), 0.0)
    o_ref[...] = (x + y).astype(o_ref.dtype)


def residual_dropout(x2d, y2d, p, seed):
    R, H = x2d.shape
    total = R * H
    # Lane-dense view: fold to a 128-wide last dim when H isn't a multiple of 128.
    if H % 128 == 0:
        Rv, Cv = R, H
    elif total % 128 == 0:
        Rv, Cv = total // 128, 128
    else:
        Rv, Cv = R, H
    xv = x2d.reshape(Rv, Cv)
    yv = y2d.reshape(Rv, Cv)
    # x, y, out tiles, each double-buffered, f32.
    block_rows = _pick_block_rows(Rv, 6 * Cv * 4, cap=1024)
    Rp = _round_up(Rv, block_rows)
    if Rp != Rv:
        xv = jnp.pad(xv, ((0, Rp - Rv), (0, 0)))
        yv = jnp.pad(yv, ((0, Rp - Rv), (0, 0)))
    seed_arr = jnp.asarray([seed], dtype=jnp.int32)
    out = pl.pallas_call(
        functools.partial(_residual_dropout_kernel, p=float(p)),
        out_shape=jax.ShapeDtypeStruct((Rp, Cv), x2d.dtype),
        grid_spec=pltpu.PrefetchScalarGridSpec(
            num_scalar_prefetch=1,
            grid=(Rp // block_rows,),
            in_specs=[
                pl.BlockSpec((block_rows, Cv), lambda i, s: (i, 0)),
                pl.BlockSpec((block_rows, Cv), lambda i, s: (i, 0)),
            ],
            out_specs=pl.BlockSpec((block_rows, Cv), lambda i, s: (i, 0)),
        ),
        compiler_params=pltpu.CompilerParams(
            dimension_semantics=("parallel",),
            vmem_limit_bytes=64 * 1024 * 1024,
        ),
    )(seed_arr, xv, yv)
    return out[:Rv].reshape(R, H)


# ------------------------------ module wrapper --------------------------------

class Linear:
    """Linear sublayer whose weights the fused kernel can consume directly."""

    def __init__(self, W, b):
        self.W = W
        self.b = b

    def __call__(self, t):
        return jnp.einsum("...h,hk->...k", t, self.W) + self.b


class SublayerConnection:
    """JAX/Pallas port of the PyTorch SublayerConnection (pre-norm residual)."""

    def __init__(self, size, dropout, eps=1e-5):
        self.size = int(size)
        self.p = float(dropout)
        self.eps = float(eps)
        # torch.nn.LayerNorm default init: weight=1, bias=0
        self.gamma = jnp.ones((self.size,), jnp.float32)
        self.beta = jnp.zeros((self.size,), jnp.float32)

    def __call__(self, x, sublayer, *, seed=0, training=True):
        B, S, H = x.shape
        assert H == self.size
        p = self.p if training else 0.0
        x2d = x.reshape(B * S, H)

        if isinstance(sublayer, Linear) and sublayer.W.shape == (H, H):
            # Fused fast path: LN -> Linear -> dropout -> residual in one kernel.
            out2d = fused_ln_linear_dropout_residual(
                x2d, sublayer.W, sublayer.b, self.gamma, self.beta,
                p=p, seed=seed, eps=self.eps)
        else:
            # Generic path: arbitrary sublayer callable runs as plain-JAX glue.
            normed = layernorm(x2d, self.gamma, self.beta,
                               eps=self.eps).reshape(B, S, H)
            y2d = sublayer(normed).reshape(B * S, H)
            out2d = residual_dropout(x2d, y2d, p, seed)
        return out2d.reshape(B, S, H)


# ---------------------------------- main --------------------------------------

if __name__ == "__main__":
    B, S, H = 2, 8, 32
    key = jax.random.PRNGKey(0)
    kx, kw, kb = jax.random.split(key, 3)

    x = jax.random.normal(kx, (B, S, H), dtype=jnp.float32)
    W = (jax.random.normal(kw, (H, H), dtype=jnp.float32)
         * (1.0 / jnp.sqrt(jnp.float32(H))))
    b = jax.random.normal(kb, (H,), dtype=jnp.float32) * 0.01

    # Plain-JAX reference (gamma=1, beta=0, eps=1e-5).
    mean = jnp.mean(x, axis=-1, keepdims=True)
    var = jnp.mean((x - mean) ** 2, axis=-1, keepdims=True)
    normed_ref = (x - mean) * jax.lax.rsqrt(var + 1e-5)
    ref = x + (jnp.einsum("bsh,hk->bsk", normed_ref, W) + b)

    # --- eval-mode check, fused path (Linear sublayer) ---
    blk = SublayerConnection(size=H, dropout=0.1)
    out_fused = blk(x, Linear(W, b), training=False)
    jax.block_until_ready(out_fused)
    assert out_fused.shape == (B, S, H)
    assert jnp.allclose(out_fused, ref, rtol=1e-4, atol=1e-4), \
        "fused path mismatch vs reference"

    # --- eval-mode check, generic path (arbitrary callable sublayer) ---
    generic_sublayer = lambda t: jnp.einsum("bsh,hk->bsk", t, W) + b
    out_generic = blk(x, generic_sublayer, training=False)
    jax.block_until_ready(out_generic)
    assert jnp.allclose(out_generic, ref, rtol=1e-4, atol=1e-4), \
        "generic path mismatch vs reference"

    # --- training-mode run with dropout active (deterministic hash PRNG) ---
    out_train = blk(x, Linear(W, b), seed=123, training=True)
    jax.block_until_ready(out_train)
    assert out_train.shape == (B, S, H)
    assert bool(jnp.all(jnp.isfinite(out_train)))

    # Generic path with dropout too (exercises the elementwise kernel's PRNG).
    out_train_g = blk(x, generic_sublayer, seed=123, training=True)
    jax.block_until_ready(out_train_g)
    assert out_train_g.shape == (B, S, H)
    assert bool(jnp.all(jnp.isfinite(out_train_g)))

    print("KERNEL_OK")
</pallas_src>

<mosaic_0001>
module attributes {stable_mosaic.version = 11 : i64} {
  func.func @_fused_kernel(%arg0: i32, %arg1: memref<1xi32, #tpu.memory_space<smem>>, %arg2: memref<16x32xf32, #tpu.memory_space<vmem>>, %arg3: memref<32x32xf32, #tpu.memory_space<vmem>>, %arg4: memref<1x32xf32, #tpu.memory_space<vmem>>, %arg5: memref<1x32xf32, #tpu.memory_space<vmem>>, %arg6: memref<1x32xf32, #tpu.memory_space<vmem>>, %arg7: memref<16x32xf32, #tpu.memory_space<vmem>>) attributes {dimension_semantics = [#tpu.dimension_semantics<parallel>], iteration_bounds = array<i64: 1>, scalar_prefetch = 1 : i64, scratch_operands = 0 : i64, tpu.core_type = #tpu.core_type<tc>, window_params = [{transform_indices = @transform_0, window_bounds = array<i64: 16, 32>}, {pipeline_mode = #tpu.pipeline_mode<synchronous>, transform_indices = @transform_1, window_bounds = array<i64: 32, 32>}, {pipeline_mode = #tpu.pipeline_mode<synchronous>, transform_indices = @transform_2, window_bounds = array<i64: 1, 32>}, {pipeline_mode = #tpu.pipeline_mode<synchronous>, transform_indices = @transform_3, window_bounds = array<i64: 1, 32>}, {pipeline_mode = #tpu.pipeline_mode<synchronous>, transform_indices = @transform_4, window_bounds = array<i64: 1, 32>}, {transform_indices = @transform_5, window_bounds = array<i64: 16, 32>}]} {
    %c0 = arith.constant 0 : index
    %c0_0 = arith.constant 0 : index
    %0 = vector.load %arg2[%c0, %c0_0] : memref<16x32xf32, #tpu.memory_space<vmem>>, vector<16x32xf32>
    %cst = arith.constant dense<0.000000e+00> : vector<16xf32>
    %1 = vector.multi_reduction <add>, %0, %cst [1] : vector<16x32xf32> to vector<16xf32>
    %2 = vector.shape_cast %1 : vector<16xf32> to vector<16x1xf32>
    %cst_1 = arith.constant 3.200000e+01 : f32
    %3 = vector.broadcast %cst_1 : f32 to vector<16x1xf32>
    %4 = arith.divf %2, %3 : vector<16x1xf32>
    %5 = vector.broadcast %4 : vector<16x1xf32> to vector<16x32xf32>
    %6 = arith.subf %0, %5 : vector<16x32xf32>
    %7 = arith.mulf %6, %6 : vector<16x32xf32>
    %cst_2 = arith.constant dense<0.000000e+00> : vector<16xf32>
    %8 = vector.multi_reduction <add>, %7, %cst_2 [1] : vector<16x32xf32> to vector<16xf32>
    %9 = vector.shape_cast %8 : vector<16xf32> to vector<16x1xf32>
    %cst_3 = arith.constant 3.200000e+01 : f32
    %10 = vector.broadcast %cst_3 : f32 to vector<16x1xf32>
    %11 = arith.divf %9, %10 : vector<16x1xf32>
    %cst_4 = arith.constant 9.99999974E-6 : f32
    %12 = vector.broadcast %cst_4 : f32 to vector<16x1xf32>
    %13 = arith.addf %11, %12 : vector<16x1xf32>
    %14 = math.rsqrt %13 : vector<16x1xf32>
    %15 = vector.broadcast %14 : vector<16x1xf32> to vector<16x32xf32>
    %16 = arith.mulf %6, %15 : vector<16x32xf32>
    %c0_5 = arith.constant 0 : index
    %c0_6 = arith.constant 0 : index
    %17 = vector.load %arg5[%c0_5, %c0_6] : memref<1x32xf32, #tpu.memory_space<vmem>>, vector<1x32xf32>
    %18 = vector.broadcast %17 : vector<1x32xf32> to vector<16x32xf32>
    %19 = arith.mulf %16, %18 : vector<16x32xf32>
    %c0_7 = arith.constant 0 : index
    %c0_8 = arith.constant 0 : index
    %20 = vector.load %arg6[%c0_7, %c0_8] : memref<1x32xf32, #tpu.memory_space<vmem>>, vector<1x32xf32>
    %21 = vector.broadcast %20 : vector<1x32xf32> to vector<16x32xf32>
    %22 = arith.addf %19, %21 : vector<16x32xf32>
    %c0_9 = arith.constant 0 : index
    %c0_10 = arith.constant 0 : index
    %23 = vector.load %arg3[%c0_9, %c0_10] : memref<32x32xf32, #tpu.memory_space<vmem>>, vector<32x32xf32>
    %cst_11 = arith.constant dense<0.000000e+00> : vector<16x32xf32>
    %24 = tpu.matmul %22, %23, %cst_11 {dimension_numbers = #tpu.dot_dimension_numbers<[1], [0], [0], [1], [0, 0, 1, 1], [], []>} : vector<16x32xf32>, vector<32x32xf32>, vector<16x32xf32> -> vector<16x32xf32>
    %c0_12 = arith.constant 0 : index
    %c0_13 = arith.constant 0 : index
    %25 = vector.load %arg4[%c0_12, %c0_13] : memref<1x32xf32, #tpu.memory_space<vmem>>, vector<1x32xf32>
    %26 = vector.broadcast %25 : vector<1x32xf32> to vector<16x32xf32>
    %27 = arith.addf %24, %26 : vector<16x32xf32>
    %28 = arith.addf %0, %27 : vector<16x32xf32>
    %c0_14 = arith.constant 0 : index
    %c0_15 = arith.constant 0 : index
    %29 = vector.load %arg7[%c0_14, %c0_15] : memref<16x32xf32, #tpu.memory_space<vmem>>, vector<16x32xf32>
    tpu.vector_store %arg7[%c0_14, %c0_15], %28 {strides = array<i32>} : memref<16x32xf32, #tpu.memory_space<vmem>>, vector<16x32xf32>,
    return
  }
  func.func @transform_0(%arg0: i32, %arg1: memref<1xi32, #tpu.memory_space<smem>>) -> (i32, i32) {
    %c0_i32 = arith.constant 0 : i32
    %c0_i32_0 = arith.constant 0 : i32
    return %arg0, %c0_i32 : i32, i32
  }
  func.func @transform_1(%arg0: i32, %arg1: memref<1xi32, #tpu.memory_space<smem>>) -> (i32, i32) {
    %c0_i32 = arith.constant 0 : i32
    %c0_i32_0 = arith.constant 0 : i32
    %c0_i32_1 = arith.constant 0 : i32
    return %c0_i32, %c0_i32_0 : i32, i32
  }
  func.func @transform_2(%arg0: i32, %arg1: memref<1xi32, #tpu.memory_space<smem>>) -> (i32, i32) {
    %c0_i32 = arith.constant 0 : i32
    %c0_i32_0 = arith.constant 0 : i32
    %c0_i32_1 = arith.constant 0 : i32
    return %c0_i32, %c0_i32_0 : i32, i32
  }
  func.func @transform_3(%arg0: i32, %arg1: memref<1xi32, #tpu.memory_space<smem>>) -> (i32, i32) {
    %c0_i32 = arith.constant 0 : i32
    %c0_i32_0 = arith.constant 0 : i32
    %c0_i32_1 = arith.constant 0 : i32
    return %c0_i32, %c0_i32_0 : i32, i32
  }
  func.func @transform_4(%arg0: i32, %arg1: memref<1xi32, #tpu.memory_space<smem>>) -> (i32, i32) {
    %c0_i32 = arith.constant 0 : i32
    %c0_i32_0 = arith.constant 0 : i32
    %c0_i32_1 = arith.constant 0 : i32
    return %c0_i32, %c0_i32_0 : i32, i32
  }
  func.func @transform_5(%arg0: i32, %arg1: memref<1xi32, #tpu.memory_space<smem>>) -> (i32, i32) {
    %c0_i32 = arith.constant 0 : i32
    %c0_i32_0 = arith.constant 0 : i32
    return %arg0, %c0_i32 : i32, i32
  }
}

</mosaic_0001>

<bundles_post_ra>
// kernel: tpu_custom_call.1
= control target key start
LH: loop header
LB: loop body
LE: loop exit
PB: predicated region body
PF: predicated region fallthrough
CT: control target
= control target key end

     0   :  { %12 = vsyncpa [#allocation5], 0  ;;  %s570_s0 = inlined_call_operand.<no memory space> [shape: s32[1], index: 0, kind: input, shape index: {}]   ;;  %s571_s1 = inlined_call_operand.hbm [shape: f32[16,32], index: 1, kind: input, shape index: {}]   ;;  %s572_s2 = inlined_call_operand.hbm [shape: f32[32,32], index: 2, kind: input, shape index: {}]   ;;  %s573_s3 = inlined_call_operand.hbm [shape: f32[1,32], index: 3, kind: input, shape index: {}]   ;;  %s574_s4 = inlined_call_operand.hbm [shape: f32[1,32], index: 4, kind: input, shape index: {}]   ;;  %s575_s5 = inlined_call_operand.hbm [shape: f32[1,32], index: 5, kind: input, shape index: {}]   ;;  %s576_s6 = inlined_call_operand.hbm [shape: f32[16,32], index: 6, kind: output, shape index: {}]  }
   0x1   :  { %13 = vsyncpa [#allocation8], 0 }
   0x2   :  { %14 = vsyncpa [#allocation11], 0 }
   0x3   :  { %15 = vsyncpa [#allocation6], 0  ;;  %s430_s0 = smov [#allocation7]   ;;  %s431_s22 = smov [#allocation10]  }
   0x4   :  { %s33_s21 = sshll.u32 %s430_s0, 4  ;;  %s56_s23 = sshll.u32 %s431_s22, 4  ;;  %s34_s21 = int_to_ptr.vmem [resolvable:$true] %s33_s21  ;;  %s473_s23 = int_to_ptr.vmem [resolvable:$true] %s56_s23 }
   0x5   :  { %s290_s26 = scalar_lea.hbm %s572_s2, 512 }
   0x6   :  { %p291_p0 = scmp.ne.s32.totalorder %s572_s2, %s290_s26  ;;  %p294_p1 = scmp.lt.u32.totalorder %s290_s26, %s572_s2 }
   0x8   :  { %p296_p2 = pnand %p294_p1, %p291_p0 }
   0xa   :  { %299 = shalt.err (!%p296_p2)
}
   0xb   :  { %s300_s7 = scalar_lea.vmem %s34_s21, 512  ;;  %p305_p4 = scmp.lt.s32.totalorder %s34_s21, %s34_s21 }
   0xc   :  { %p301_p3 = scmp.ne.s32.totalorder %s34_s21, %s300_s7  ;;  %p306_p5 = scmp.lt.s32.totalorder %s300_s7, %s300_s7 }
   0xe   :  { %p307_p6 = por %p306_p5, %p305_p4 }
  0x10   :  { %p308_p7 = pnand %p307_p6, %p301_p3 }
  0x12   :  { %311 = shalt.err (!%p308_p7)
}
  0x13   :  { %s432_s8 = smov 128   ;;  %s433_s9 = smov 8  }
  0x14   :  { %39 = dma.hbm_to_vmem [thread:$0]  %s572_s2, 512, %s34_s21, [#allocation8], %s432_s8, %s432_s8, %s433_s9  }
  0x15   :  { %s312_s14 = scalar_lea.hbm %s574_s4, 16 }
  0x16   :  { %p313_p8 = scmp.ne.s32.totalorder %s574_s4, %s312_s14  ;;  %p316_p9 = scmp.lt.u32.totalorder %s312_s14, %s574_s4 }
  0x18   :  { %p318_p10 = pnand %p316_p9, %p313_p8 }
  0x1a   :  { %321 = shalt.err (!%p318_p10)
}
  0x1b   :  { %s322_s19 = scalar_lea.vmem %s473_s23, 16  ;;  %s326_s2 = scalar_lea.vmem %s473_s23, 32 }
  0x1c   :  { %p323_p11 = scmp.ne.s32.totalorder %s473_s23, %s322_s19  ;;  %p327_p12 = scmp.lt.s32.totalorder %s473_s23, %s473_s23 }
  0x1d   :  { %p328_p13 = scmp.lt.s32.totalorder %s326_s2, %s322_s19 }
  0x1f   :  { %p329_p0 = por %p328_p13, %p327_p12 }
  0x21   :  { %p330_p1 = pnand %p329_p0, %p323_p11 }
  0x23   :  { %333 = shalt.err (!%p330_p1)
}
  0x24   :  { %59 = dma.hbm_to_vmem [thread:$0]  %s574_s4, 16, %s473_s23, [#allocation11]  }
  0x25   :  { %s434_s21 = smov [#allocation4]   ;;  %s435_s24 = smov [#allocation9]  }
  0x26   :  { %s21_s22 = sshll.u32 %s434_s21, 4  ;;  %s46_s25 = sshll.u32 %s435_s24, 4  ;;  %s22_s22 = int_to_ptr.vmem [resolvable:$true] %s21_s22  ;;  %s47_s25 = int_to_ptr.vmem [resolvable:$true] %s46_s25 }
  0x27   :  { %s334_s28 = scalar_lea.hbm %s571_s1, 256 }
  0x28   :  { %p335_p2 = scmp.ne.s32.totalorder %s571_s1, %s334_s28  ;;  %p338_p3 = scmp.lt.u32.totalorder %s334_s28, %s571_s1 }
  0x2a   :  { %p340_p4 = pnand %p338_p3, %p335_p2 }
  0x2c   :  { %343 = shalt.err (!%p340_p4)
}
  0x2d   :  { %s344_s4 = scalar_lea.vmem %s22_s22, 256  ;;  %p349_p6 = scmp.lt.s32.totalorder %s22_s22, %s22_s22 }
  0x2e   :  { %p345_p5 = scmp.ne.s32.totalorder %s22_s22, %s344_s4  ;;  %p350_p7 = scmp.lt.s32.totalorder %s344_s4, %s344_s4 }
  0x30   :  { %p351_p8 = por %p350_p7, %p349_p6 }
  0x32   :  { %p352_p9 = pnand %p351_p8, %p345_p5 }
  0x34   :  { %355 = shalt.err (!%p352_p9)
}
  0x35   :  { %27 = dma.hbm_to_vmem [thread:$0]  %s571_s1, 256, %s22_s22, [#allocation5], %s432_s8, %s432_s8, %s433_s9  }
  0x36   :  { %s356_s14 = scalar_lea.hbm %s573_s3, 16 }
  0x37   :  { %p357_p10 = scmp.ne.s32.totalorder %s573_s3, %s356_s14  ;;  %p360_p11 = scmp.lt.u32.totalorder %s356_s14, %s573_s3 }
  0x39   :  { %p362_p12 = pnand %p360_p11, %p357_p10 }
  0x3b   :  { %365 = shalt.err (!%p362_p12)
}
  0x3c   :  { %s366_s19 = scalar_lea.vmem %s47_s25, 16  ;;  %s370_s2 = scalar_lea.vmem %s47_s25, 32 }
  0x3d   :  { %p367_p13 = scmp.ne.s32.totalorder %s47_s25, %s366_s19  ;;  %p371_p0 = scmp.lt.s32.totalorder %s47_s25, %s47_s25 }
  0x3e   :  { %p372_p1 = scmp.lt.s32.totalorder %s370_s2, %s366_s19 }
  0x40   :  { %p373_p2 = por %p372_p1, %p371_p0 }
  0x42   :  { %p374_p3 = pnand %p373_p2, %p367_p13 }
  0x44   :  { %377 = shalt.err (!%p374_p3)
}
  0x45   :  { %49 = dma.hbm_to_vmem [thread:$0]  %s573_s3, 16, %s47_s25, [#allocation8]  }
  0x46   :  { %s436_s0 = smov [#allocation12]   ;;  %s378_s26 = scalar_lea.hbm %s575_s5, 16 }
  0x47   :  { %s66_s21 = sshll.u32 %s436_s0, 4  ;;  %p379_p4 = scmp.ne.s32.totalorder %s575_s5, %s378_s26  ;;  %s67_s21 = int_to_ptr.vmem [resolvable:$true] %s66_s21 }
  0x48   :  { %p382_p5 = scmp.lt.u32.totalorder %s378_s26, %s575_s5 }
  0x4a   :  { %p384_p6 = pnand %p382_p5, %p379_p4 }
  0x4c   :  { %387 = shalt.err (!%p384_p6)
}
  0x4d   :  { %s388_s7 = scalar_lea.vmem %s67_s21, 16  ;;  %s392_s3 = scalar_lea.vmem %s67_s21, 32 }
  0x4e   :  { %p389_p7 = scmp.ne.s32.totalorder %s67_s21, %s388_s7  ;;  %p393_p8 = scmp.lt.s32.totalorder %s67_s21, %s67_s21 }
  0x4f   :  { %p394_p9 = scmp.lt.s32.totalorder %s392_s3, %s388_s7 }
  0x51   :  { %p395_p10 = por %p394_p9, %p393_p8 }
  0x53   :  { %p396_p11 = pnand %p395_p10, %p389_p7 }
  0x55   :  { %399 = shalt.err (!%p396_p11)
}
  0x56   :  { %69 = dma.hbm_to_vmem [thread:$0]  %s575_s5, 16, %s67_s21, [#allocation11]  }
  0x57   :  { %422 = dma.done.wait [#allocation5], 256  }
  0x58   :  { %423 = vsyncadd [#allocation5], 4294967040 }
  0x59   :  { %424 = dma.done.wait [#allocation8], 528  }
  0x5a   :  { %425 = vsyncadd [#allocation8], 4294966768 }
  0x5b   :  { %426 = dma.done.wait [#allocation11], 32  }
  0x5c   :  { %427 = vsyncadd [#allocation11], 4294967264  ;;  %vm87_vm0 = vcmask 261120   ;;  %v85_v0 = vld [vmem:[#allocation4] sm:$0xff]  ;;  %v86_v1 = vld [vmem:[#allocation4 + $0x8] sm:$0xff]  ;;  %s437_s5 = smov [#allocation13]  }
  0x5d   :  { %v88_v2 = vsel %vm87_vm0, %v85_v0, 0.0  ;;  %v91_v3 = vsel %vm87_vm0, %v86_v1, 0.0  ;;  %v133_v14 = vld [vmem:[#allocation7] sm:$0xff]  ;;  %v134_v15 = vld [vmem:[#allocation7 + $0x8] sm:$0xff]  ;;  %v135_v16 = vld [vmem:[#allocation7 + $0x10] sm:$0xff]  ;;  %s234_s4 = sshll.u32 %s437_s5, 4  ;;  %s235_s4 = int_to_ptr.vmem [resolvable:$true] %s234_s4 }
  0x5e   :  { %89 = vadd.xlane.f32.xlu0 %v88_v2  ;;  %v270_v17 = vpack.c.bf16 %v134_v15, %v133_v14  ;;  %v136_v18 = vld [vmem:[#allocation7 + $0x18] sm:$0xff]  ;;  %v248_v27 = vld [vmem:[#allocation10] ss:$0 sm:$0xff]  ;;  %v249_v29 = vld [vmem:[#allocation12] ss:$0 sm:$0xff]  ;;  %s400_s23 = scalar_lea.vmem %s235_s4, 256  ;;  %p405_p13 = scmp.lt.s32.totalorder %s235_s4, %s235_s4 }
  0x5f   :  { %v274_v19 = vpack.c.bf16 %v136_v18, %v135_v16  ;;  %v250_v36 = vld [vmem:[#allocation9] ss:$0 sm:$0xff]  ;;  %p401_p12 = scmp.ne.s32.totalorder %s235_s4, %s400_s23  ;;  %p406_p0 = scmp.lt.s32.totalorder %s400_s23, %s400_s23 }
  0x60   :  { %271 = vmatprep.subr.bf16.mxu0 %v270_v17 }
  0x61   :  { %273 = vmatpush3.bf16.msra.mxu0 %v270_v17  ;;  %p407_p1 = por %p406_p0, %p405_p13 }
  0x62   :  { %92 = vadd.xlane.f32.xlu0 %v91_v3  ;;  %275 = vmatprep.subr.bf16.mxu0 %v274_v19 }
  0x63   :  { %p408_p2 = pnand %p407_p1, %p401_p12 }
  0x65   :  { %277 = vmatpush3.bf16.msra.mxu0 %v274_v19 }
  0xeb   :  { %v90_v4 = vpop.xlane.xlu0 %89 }
  0xec   :  { %v95_v5 = vmul.f32 0.03125, %v90_v4 }
  0xee   :  { %v97_v6 = vsub.f32 %v85_v0, %v95_v5 }
  0xef   :  { %v93_v7 = vpop.xlane.xlu0 %92 }
  0xf0   :  { %v96_v8 = vmul.f32 0.03125, %v93_v7  ;;  %v99_v9 = vmul.f32 %v97_v6, %v97_v6 }
  0xf2   :  { %v98_v10 = vsub.f32 %v86_v1, %v96_v8  ;;  %v101_v11 = vsel %vm87_vm0, %v99_v9, 0.0 }
  0xf3   :  { %102 = vadd.xlane.f32.xlu1 %v101_v11 }
  0xf4   :  { %v100_v12 = vmul.f32 %v98_v10, %v98_v10 }
  0xf6   :  { %v104_v13 = vsel %vm87_vm0, %v100_v12, 0.0 }
  0xf7   :  { %105 = vadd.xlane.f32.xlu1 %v104_v13 }
 0x180   :  { %v103_v20 = vpop.xlane.xlu1 %102 }
 0x181   :  { %v107_v21 = vmul.f32 0.03125, %v103_v20 }
 0x183   :  { %v109_v22 = vadd.f32 1e-05, %v107_v21 }
 0x184   :  { %v106_v23 = vpop.xlane.xlu1 %105 }
 0x185   :  { %286 = vrsqrt.f32 %v109_v22  ;;  %v108_v24 = vmul.f32 0.03125, %v106_v23 }
 0x187   :  { %v110_v25 = vadd.f32 1e-05, %v108_v24 }
 0x189   :  { %288 = vrsqrt.f32 %v110_v25 }
 0x18f   :  { %v287_v26 = vpop.eup %286 }
 0x190   :  { %v113_v28 = vmul.f32 %v287_v26, %v97_v6 }
 0x192   :  { %v122_v30 = vmul.f32 %v248_v27, %v113_v28 }
 0x193   :  { %v289_v31 = vpop.eup %288 }
 0x194   :  { %v114_v32 = vmul.f32 %v289_v31, %v98_v10  ;;  %v131_v33 = vadd.f32 %v249_v29, %v122_v30 }
 0x196   :  { %v123_v34 = vmul.f32 %v248_v27, %v114_v32  ;;  %267 = vmatprep.mubr.msk.f32.mxu0 %vm87_vm0, %v131_v33 }
 0x198   :  { %v132_v35 = vadd.f32 %v249_v29, %v123_v34 }
 0x19a   :  { %268 = vmatmul.mubr.msk.f32.vlgmr.msra.gmra.mrb[0].mxu0 %vm87_vm0, %v132_v35 }
 0x26d   :  { %v269_v37 = vpop.f32.mrb[0].mxu0 }
 0x26e   :  { %v222_v38 = vadd.f32 %v269_v37, %v250_v36  ;;  %v216_v39 = vpop.f32.mrb[1].mxu0 }
 0x26f   :  { %v217_v40 = vadd.f32 %v250_v36, %v216_v39 }
 0x270   :  { %v226_v41 = vadd.f32 %v222_v38, %v86_v1 }
 0x271   :  { %v225_v42 = vadd.f32 %v217_v40, %v85_v0 }
 0x272   :  { %228 = vst.msk [vmem:[#allocation13 + $0x8] sm:$0xff] %vm87_vm0, %v226_v41 }
 0x273   :  { %227 = vst.msk [vmem:[#allocation13] sm:$0xff] %vm87_vm0, %v225_v42 }
 0x274   :  { %411 = shalt.err (!%p408_p2)
}
 0x275   :  { %s412_s13 = scalar_lea.hbm %s576_s6, 256 }
 0x276   :  { %p413_p3 = scmp.ne.s32.totalorder %s576_s6, %s412_s13  ;;  %p416_p4 = scmp.lt.u32.totalorder %s412_s13, %s576_s6 }
 0x278   :  { %p418_p5 = pnand %p416_p4, %p413_p3 }
 0x27a   :  { %421 = shalt.err (!%p418_p5)
}
 0x27b   :  { %240 = dma.vmem_to_hbm [thread:$0]  %s235_s4, 256, %s576_s6, [#allocation6], %s432_s8, %s432_s8, %s433_s9  }
 0x27c   :  { %428 = dma.done.wait [#allocation6], 256  }
 0x27d   :  { %429 = vsyncadd [#allocation6], 4294967040 }
 0x27e   :  { %244 = vsyncpa [#allocation5], 1 }
 0x27f   :  { %245 = vsyncpa [#allocation8], 1 }
 0x280   :  { %246 = vsyncpa [#allocation11], 1 }
 0x281   :  { %247 = vsyncpa [#allocation6], 1 }

</bundles_post_ra>
